<compile_context>
chip_gen: v7x
topology: tpu7x:2x2x1
jax: 0.10.0
libtpu: 0.0.40
codegen_flags: <defaults>
</compile_context>

<pallas_src>
import numpy as np
import jax
import jax.numpy as jnp
from jax import lax
from jax.experimental import pallas as pl
from jax.experimental.pallas import tpu as pltpu

# ---- quantizer constants (4-bit, centered) -----------------------------------
BITS = 4
N_LEVELS = 2 ** BITS                       # 16
OPTIMAL_GAUSSIAN_SCALE_4BIT = 2.513930578568423
HAD_DIM = 128
HAD_SCALE = 2.0 ** (-7.0 / 2.0)            # 1/sqrt(128)
_MIB = 1024 * 1024


def hadamard_matrix(n: int) -> np.ndarray:
    """Sylvester construction of the n x n Hadamard matrix (n power of 2)."""
    H = np.array([[1.0]], dtype=np.float32)
    while H.shape[0] < n:
        H = np.block([[H, H], [H, -H]])
    return H.astype(np.float32)


H_SCALED = jnp.asarray(hadamard_matrix(HAD_DIM) * HAD_SCALE)   # (128, 128) f32


def quant_dequant_hadamard_ref(x: jnp.ndarray) -> jnp.ndarray:
    """Plain-JAX reference of quantize_pack_hadamard_dense + dequantize_dense."""
    x = x.astype(jnp.float32)
    shp = x.shape
    xh = (x.reshape(-1, HAD_DIM) @ H_SCALED).reshape(shp)
    std = jnp.sqrt(jnp.mean(xh * xh, axis=-1, keepdims=True)) + 1e-8
    scale = OPTIMAL_GAUSSIAN_SCALE_4BIT * std
    step = 2.0 * scale / (N_LEVELS - 1)
    xc = jnp.clip(xh, -scale, scale)
    xq = jnp.round((xc + scale) / step)
    return xq * step - scale


def _round_up(a: int, b: int) -> int:
    return (a + b - 1) // b * b


def _vmem_capacity_bytes() -> int:
    """Best-effort per-core VMEM capacity; conservative (v7x-sized) fallback."""
    try:
        info = pltpu.get_tpu_info()
        for name in ("vmem_capacity_bytes", "vmem_bytes", "vmem_size_bytes"):
            cap = getattr(info, name, None)
            if cap:
                return int(cap)
    except Exception:
        pass
    return 64 * _MIB


# ---- Pallas kernel ------------------------------------------------------------
def linear4bit_kernel(x_ref, h_ref, w_ref, b_ref, o_ref, xdq_ref):
    # x_ref:  (tm, K)   native x dtype   activation tile (full in_features)
    # h_ref:  (128,128) f32              scaled Hadamard matrix
    # w_ref:  (K, tn)   bf16             pre-transposed dequantized weight tile
    # b_ref:  (1, tn)   f32              bias tile
    # o_ref:  (tm, tn)  x dtype          output tile
    # xdq_ref:(tm, K)   bf16             VMEM scratch: quant/dequant'd x, cached across j
    j = pl.program_id(1)
    tm, K = x_ref.shape
    nblk = K // HAD_DIM

    @pl.when(j == 0)
    def _quantize_activation():
        h = h_ref[...]
        unroll = nblk <= 8   # unrolled (constant-folded slices) for small K, rolled for big K

        # Pass 1: blockwise Hadamard on 128-lane-aligned slices; accumulate per-row
        # sum of squares over the FULL in_features.  No full-K f32 temporaries.
        def _ssq_block(k, ssq):
            off = pl.multiple_of(k * HAD_DIM, HAD_DIM)
            xk = x_ref[:, pl.ds(off, HAD_DIM)].astype(jnp.float32)
            xh = jnp.dot(xk, h, preferred_element_type=jnp.float32)
            return ssq + jnp.sum(xh * xh, axis=-1, keepdims=True)

        ssq = lax.fori_loop(0, nblk, _ssq_block,
                            jnp.zeros((tm, 1), jnp.float32), unroll=unroll)

        # Per-row RMS -> scale / step (exact f32).  Zero-padded rows give std ~ 1e-8,
        # which stays finite (xq == (n_levels-1)/2, xdq ~ 1e-9) and is sliced off outside.
        std = jnp.sqrt(ssq / K) + 1e-8
        scale = OPTIMAL_GAUSSIAN_SCALE_4BIT * std
        step = 2.0 * scale / (N_LEVELS - 1)
        # Exact reciprocal on the tiny (tm, 1) tensor keeps rounding boundaries exact
        # w.r.t. the reference; the big tensor only sees a multiply.
        inv_step = 1.0 / step

        # Pass 2: recompute each 128-lane Hadamard block, quantize/dequantize, and write
        # it straight into the bf16 xdq cache (bounded live ranges, no concatenate).
        def _quant_block(k, carry):
            off = pl.multiple_of(k * HAD_DIM, HAD_DIM)
            xk = x_ref[:, pl.ds(off, HAD_DIM)].astype(jnp.float32)
            xh = jnp.dot(xk, h, preferred_element_type=jnp.float32)
            xc = jnp.clip(xh, -scale, scale)
            xq = jnp.round((xc + scale) * inv_step)
            xdq_ref[:, pl.ds(off, HAD_DIM)] = (xq * step - scale).astype(xdq_ref.dtype)
            return carry

        lax.fori_loop(0, nblk, _quant_block, 0, unroll=unroll)

    # out = x_dq @ wq_t + bias   (bf16 operands, f32 accumulation on the MXU)
    out = jnp.dot(xdq_ref[...], w_ref[...], preferred_element_type=jnp.float32)
    o_ref[...] = (out + b_ref[...]).astype(o_ref.dtype)


# ---- module-style wrapper ------------------------------------------------------
class Linear4bitPallas:
    """Pallas-TPU equivalent of the PyTorch Linear4bit module.

    __init__ mirrors the module __init__: the weight is Hadamard-quantized / dequantized
    ONCE and stored pre-transposed (K, N_pad) in bf16, padded once (never per forward).
    __call__ mirrors forward(): in-kernel activation quant/dequant + MXU matmul + bias.
    """

    def __init__(self, weight, bias=None, *, tn=None):
        weight = jnp.asarray(weight, dtype=jnp.float32)            # (N, K)
        N, K = weight.shape
        assert K % HAD_DIM == 0, "in_features must be a multiple of 128 (Hadamard block)"
        self.N, self.K = N, K

        # Per-generation VMEM budget: ~96 MiB on 128-MiB chips (v5e/v6e),
        # ~48 MiB under v7x's 64-MiB-per-TC, never above 100 MiB.
        cap = _vmem_capacity_bytes()
        self.vmem_limit = int(min(cap * 3 // 4, 100 * _MIB))

        # N tiling: keep the whole bf16 weight resident (tn == N_pad -> constant weight
        # block index -> DMA'd exactly once per call) when it comfortably fits;
        # otherwise stream 256-wide tiles.
        n128 = _round_up(N, 128)
        if tn is None:
            tn = n128 if (K * n128 * 2) <= self.vmem_limit // 4 else 256
        self.tn = min(_round_up(tn, 128), n128)
        self.N_pad = _round_up(N, self.tn)

        # Init-time weight quant/dequant (plain-JAX glue), transposed + padded ONCE.
        wq = quant_dequant_hadamard_ref(weight)                    # (N, K) f32
        w_t = jnp.asarray(wq.T, dtype=jnp.bfloat16)                # (K, N) bf16
        if self.N_pad != N:
            w_t = jnp.pad(w_t, ((0, 0), (0, self.N_pad - N)))
        self.wq_t = w_t                                            # (K, N_pad) bf16

        b = jnp.zeros((N,), jnp.float32) if bias is None else jnp.asarray(bias, jnp.float32)
        b = b.reshape(1, N)
        if self.N_pad != N:
            b = jnp.pad(b, ((0, 0), (0, self.N_pad - N)))
        self.bias = b                                              # (1, N_pad) f32

    def _pick_tm(self, M: int, x_itemsize: int, sublane: int) -> int:
        """Largest tm whose pipeline windows + scratch fit the VMEM budget."""
        budget = int(self.vmem_limit * 0.85)       # headroom for Mosaic internal scratch
        fixed = (2 * self.K * self.tn * 2          # double-buffered weight window (bf16)
                 + 2 * self.tn * 4                 # bias window
                 + 2 * HAD_DIM * HAD_DIM * 4)      # Hadamard matrix window
        tm_sel = sublane
        for tm in (1024, 768, 512, 384, 256, 192, 128, 64, 32, 16, 8):
            if tm % sublane:
                continue
            per = (2 * tm * self.K * x_itemsize        # double-buffered x window
                   + tm * self.K * 2                   # bf16 xdq cache (scratch)
                   + 2 * tm * self.tn * x_itemsize)    # double-buffered output window
            if fixed + per <= budget:
                tm_sel = tm
                break
        return max(sublane, min(tm_sel, _round_up(max(M, 1), sublane)))

    def __call__(self, x):
        lead = x.shape[:-1]
        K, N, N_pad, tn = self.K, self.N, self.N_pad, self.tn
        assert x.shape[-1] == K
        if not jnp.issubdtype(x.dtype, jnp.floating):
            x = x.astype(jnp.float32)

        # Keep x in its native dtype (bf16 activations halve x HBM bytes and VMEM);
        # the kernel upcasts per 128-block for the Hadamard/quant math.
        x2 = x.reshape(-1, K)
        M = x2.shape[0]
        out_dtype = x2.dtype
        x_itemsize = x2.dtype.itemsize
        sublane = 8 if x_itemsize >= 4 else (16 if x_itemsize == 2 else 32)

        tm = self._pick_tm(M, x_itemsize, sublane)
        M_pad = _round_up(M, tm)
        if M_pad != M:
            x2 = jnp.pad(x2, ((0, M_pad - M), (0, 0)))

        grid = (M_pad // tm, N_pad // tn)

        # Advisory cost: main dot + Hadamard computed twice (sum-of-squares + quantize pass).
        flops = 2 * M_pad * N_pad * K + 2 * (2 * M_pad * K * HAD_DIM)
        w_streams = 1 if grid[1] == 1 else grid[0]
        bytes_accessed = (M_pad * K * x_itemsize
                          + w_streams * K * N_pad * 2
                          + N_pad * 4
                          + M_pad * N_pad * x_itemsize)

        out = pl.pallas_call(
            linear4bit_kernel,
            out_shape=jax.ShapeDtypeStruct((M_pad, N_pad), out_dtype),
            grid_spec=pltpu.PrefetchScalarGridSpec(
                num_scalar_prefetch=0,
                grid=grid,
                in_specs=[
                    pl.BlockSpec((tm, K), lambda i, j: (i, 0)),           # x tile (full K)
                    pl.BlockSpec((HAD_DIM, HAD_DIM), lambda i, j: (0, 0)),# Hadamard matrix
                    pl.BlockSpec((K, tn), lambda i, j: (0, j)),           # weight (K, tn)
                    pl.BlockSpec((1, tn), lambda i, j: (0, j)),           # bias (1, tn)
                ],
                out_specs=pl.BlockSpec((tm, tn), lambda i, j: (i, j)),
                scratch_shapes=[pltpu.VMEM((tm, K), jnp.bfloat16)],       # cached x_dq
            ),
            compiler_params=pltpu.CompilerParams(
                # i is "parallel" (megacore splits distinct M tiles); j must stay
                # "arbitrary" so the per-i x_dq cache + pl.when(j == 0) init are valid.
                dimension_semantics=("parallel", "arbitrary"),
                vmem_limit_bytes=self.vmem_limit,
            ),
            cost_estimate=pl.CostEstimate(
                flops=int(flops), transcendentals=int(2 * M_pad),
                bytes_accessed=int(bytes_accessed)),
        )(x2, H_SCALED, self.wq_t, self.bias)

        return out[:M, :N].reshape(*lead, N)


# ---- demo / self-check --------------------------------------------------------
if __name__ == "__main__":
    key = jax.random.PRNGKey(0)
    k_w, k_b, k_x = jax.random.split(key, 3)

    in_features = 256      # multiple of 128 (two Hadamard blocks)
    out_features = 256
    batch, seq = 2, 4      # leading dims; flattened M = 8

    # Deterministic synthetic parameters (module __init__ semantics):
    weight = jax.random.normal(k_w, (out_features, in_features), dtype=jnp.float32) * 0.05
    bias = jax.random.normal(k_b, (out_features,), dtype=jnp.float32) * 0.01
    x = jax.random.normal(k_x, (batch, seq, in_features), dtype=jnp.float32)

    layer = Linear4bitPallas(weight, bias)

    # Reference (pure JAX) against the same stored bf16 weight buffer; the kernel's extra
    # deviation is the bf16 MXU dot + bf16 x_dq cache (re-validate tolerance at large K).
    wq_store = layer.wq_t[:, :out_features].astype(jnp.float32)     # (K, N)

    def ref_forward(xx):
        x_dq = quant_dequant_hadamard_ref(xx)
        return x_dq.reshape(-1, in_features) @ wq_store + bias

    # f32 activations
    out = jax.block_until_ready(layer(x))
    ref = ref_forward(x).reshape(batch, seq, out_features)
    np.testing.assert_allclose(np.asarray(out, np.float32), np.asarray(ref),
                               rtol=1e-2, atol=1e-2)

    # bf16 activations (native-dtype ingestion path; output follows the activation dtype)
    x_bf16 = x.astype(jnp.bfloat16)
    out_bf16 = jax.block_until_ready(layer(x_bf16))
    ref_bf16 = ref_forward(x_bf16).reshape(batch, seq, out_features)
    np.testing.assert_allclose(np.asarray(out_bf16, np.float32), np.asarray(ref_bf16),
                               rtol=3e-2, atol=3e-2)

    print("KERNEL_OK")
</pallas_src>

<mosaic_0001>
module attributes {stable_mosaic.version = 11 : i64} {
  func.func @linear4bit_kernel(%arg0: i32, %arg1: i32, %arg2: memref<8x256xf32, #tpu.memory_space<vmem>>, %arg3: memref<128x128xf32, #tpu.memory_space<vmem>>, %arg4: memref<256x256xbf16, #tpu.memory_space<vmem>>, %arg5: memref<1x256xf32, #tpu.memory_space<vmem>>, %arg6: memref<8x256xf32, #tpu.memory_space<vmem>>, %arg7: memref<8x256xbf16, #tpu.memory_space<vmem>>) attributes {dimension_semantics = [#tpu.dimension_semantics<parallel>, #tpu.dimension_semantics<arbitrary>], iteration_bounds = array<i64: 1, 1>, scalar_prefetch = 0 : i64, scratch_operands = 1 : i64, tpu.core_type = #tpu.core_type<tc>, window_params = [{transform_indices = @transform_0, window_bounds = array<i64: 8, 256>}, {pipeline_mode = #tpu.pipeline_mode<synchronous>, transform_indices = @transform_1, window_bounds = array<i64: 128, 128>}, {transform_indices = @transform_2, window_bounds = array<i64: 256, 256>}, {transform_indices = @transform_3, window_bounds = array<i64: 1, 256>}, {transform_indices = @transform_4, window_bounds = array<i64: 8, 256>}]} {
    %c0_i32 = arith.constant 0 : i32
    %0 = arith.cmpi eq, %arg1, %c0_i32 : i32
    %1 = arith.extui %0 : i1 to i32
    %c0_i32_0 = arith.constant 0 : i32
    %2 = arith.cmpi ne, %1, %c0_i32_0 : i32
    scf.if %2 {
      %c0_8 = arith.constant 0 : index
      %c0_9 = arith.constant 0 : index
      %10 = vector.load %arg3[%c0_8, %c0_9] : memref<128x128xf32, #tpu.memory_space<vmem>>, vector<128x128xf32>
      %cst_10 = arith.constant 0.000000e+00 : f32
      %11 = vector.broadcast %cst_10 : f32 to vector<8x1xf32>
      %c0_i32_11 = arith.constant 0 : i32
      %c128_i32 = arith.constant 128 : i32
      %12 = arith.muli %c0_i32_11, %c128_i32 : i32
      %13 = tpu.assume_multiple %12, 128 : i32
      %c0_12 = arith.constant 0 : index
      %14 = arith.index_cast %13 : i32 to index
      %15 = vector.load %arg2[%c0_12, %14] : memref<8x256xf32, #tpu.memory_space<vmem>>, vector<8x128xf32>
      %cst_13 = arith.constant dense<0.000000e+00> : vector<8x128xf32>
      %16 = tpu.matmul %15, %10, %cst_13 {dimension_numbers = #tpu.dot_dimension_numbers<[1], [0], [0], [1], [0, 0, 1, 1], [], []>} : vector<8x128xf32>, vector<128x128xf32>, vector<8x128xf32> -> vector<8x128xf32>
      %17 = arith.mulf %16, %16 : vector<8x128xf32>
      %cst_14 = arith.constant dense<0.000000e+00> : vector<8xf32>
      %18 = vector.multi_reduction <add>, %17, %cst_14 [1] : vector<8x128xf32> to vector<8xf32>
      %19 = vector.shape_cast %18 : vector<8xf32> to vector<8x1xf32>
      %20 = arith.addf %11, %19 : vector<8x1xf32>
      %c1_i32 = arith.constant 1 : i32
      %c128_i32_15 = arith.constant 128 : i32
      %21 = arith.muli %c1_i32, %c128_i32_15 : i32
      %22 = tpu.assume_multiple %21, 128 : i32
      %c0_16 = arith.constant 0 : index
      %23 = arith.index_cast %22 : i32 to index
      %24 = vector.load %arg2[%c0_16, %23] : memref<8x256xf32, #tpu.memory_space<vmem>>, vector<8x128xf32>
      %cst_17 = arith.constant dense<0.000000e+00> : vector<8x128xf32>
      %25 = tpu.matmul %24, %10, %cst_17 {dimension_numbers = #tpu.dot_dimension_numbers<[1], [0], [0], [1], [0, 0, 1, 1], [], []>} : vector<8x128xf32>, vector<128x128xf32>, vector<8x128xf32> -> vector<8x128xf32>
      %26 = arith.mulf %25, %25 : vector<8x128xf32>
      %cst_18 = arith.constant dense<0.000000e+00> : vector<8xf32>
      %27 = vector.multi_reduction <add>, %26, %cst_18 [1] : vector<8x128xf32> to vector<8xf32>
      %28 = vector.shape_cast %27 : vector<8xf32> to vector<8x1xf32>
      %29 = arith.addf %20, %28 : vector<8x1xf32>
      %c2_i32 = arith.constant 2 : i32
      %cst_19 = arith.constant 2.560000e+02 : f32
      %30 = vector.broadcast %cst_19 : f32 to vector<8x1xf32>
      %31 = arith.divf %29, %30 : vector<8x1xf32>
      %32 = math.sqrt %31 : vector<8x1xf32>
      %cst_20 = arith.constant 9.99999993E-9 : f32
      %33 = vector.broadcast %cst_20 : f32 to vector<8x1xf32>
      %34 = arith.addf %32, %33 : vector<8x1xf32>
      %cst_21 = arith.constant 2.51393056 : f32
      %35 = vector.broadcast %cst_21 : f32 to vector<8x1xf32>
      %36 = arith.mulf %35, %34 : vector<8x1xf32>
      %cst_22 = arith.constant 2.000000e+00 : f32
      %37 = vector.broadcast %cst_22 : f32 to vector<8x1xf32>
      %38 = arith.mulf %37, %36 : vector<8x1xf32>
      %cst_23 = arith.constant 1.500000e+01 : f32
      %39 = vector.broadcast %cst_23 : f32 to vector<8x1xf32>
      %40 = arith.divf %38, %39 : vector<8x1xf32>
      %cst_24 = arith.constant 1.000000e+00 : f32
      %41 = vector.broadcast %cst_24 : f32 to vector<8x1xf32>
      %42 = arith.divf %41, %40 : vector<8x1xf32>
      %c0_i32_25 = arith.constant 0 : i32
      %c128_i32_26 = arith.constant 128 : i32
      %43 = arith.muli %c0_i32_25, %c128_i32_26 : i32
      %44 = tpu.assume_multiple %43, 128 : i32
      %c0_27 = arith.constant 0 : index
      %45 = arith.index_cast %44 : i32 to index
      %46 = vector.load %arg2[%c0_27, %45] : memref<8x256xf32, #tpu.memory_space<vmem>>, vector<8x128xf32>
      %cst_28 = arith.constant dense<0.000000e+00> : vector<8x128xf32>
      %47 = tpu.matmul %46, %10, %cst_28 {dimension_numbers = #tpu.dot_dimension_numbers<[1], [0], [0], [1], [0, 0, 1, 1], [], []>} : vector<8x128xf32>, vector<128x128xf32>, vector<8x128xf32> -> vector<8x128xf32>
      %cst_29 = arith.constant 0.000000e+00 : f32
      %48 = vector.broadcast %cst_29 : f32 to vector<8x1xf32>
      %49 = arith.subf %48, %36 : vector<8x1xf32>
      %50 = vector.broadcast %49 : vector<8x1xf32> to vector<8x128xf32>
      %51 = arith.maximumf %50, %47 : vector<8x128xf32>
      %52 = vector.broadcast %36 : vector<8x1xf32> to vector<8x128xf32>
      %53 = arith.minimumf %52, %51 : vector<8x128xf32>
      %54 = vector.broadcast %36 : vector<8x1xf32> to vector<8x128xf32>
      %55 = arith.addf %53, %54 : vector<8x128xf32>
      %56 = vector.broadcast %42 : vector<8x1xf32> to vector<8x128xf32>
      %57 = arith.mulf %55, %56 : vector<8x128xf32>
      %58 = math.roundeven %57 : vector<8x128xf32>
      %59 = vector.broadcast %40 : vector<8x1xf32> to vector<8x128xf32>
      %60 = arith.mulf %58, %59 : vector<8x128xf32>
      %61 = vector.broadcast %36 : vector<8x1xf32> to vector<8x128xf32>
      %62 = arith.subf %60, %61 : vector<8x128xf32>
      %63 = arith.truncf %62 : vector<8x128xf32> to vector<8x128xbf16>
      %c0_30 = arith.constant 0 : index
      %64 = arith.index_cast %44 : i32 to index
      %65 = vector.load %arg7[%c0_30, %64] : memref<8x256xbf16, #tpu.memory_space<vmem>>, vector<8x128xbf16>
      tpu.vector_store %arg7[%c0_30, %64], %63 {strides = array<i32>} : memref<8x256xbf16, #tpu.memory_space<vmem>>, vector<8x128xbf16>,
      %c1_i32_31 = arith.constant 1 : i32
      %c128_i32_32 = arith.constant 128 : i32
      %66 = arith.muli %c1_i32_31, %c128_i32_32 : i32
      %67 = tpu.assume_multiple %66, 128 : i32
      %c0_33 = arith.constant 0 : index
      %68 = arith.index_cast %67 : i32 to index
      %69 = vector.load %arg2[%c0_33, %68] : memref<8x256xf32, #tpu.memory_space<vmem>>, vector<8x128xf32>
      %cst_34 = arith.constant dense<0.000000e+00> : vector<8x128xf32>
      %70 = tpu.matmul %69, %10, %cst_34 {dimension_numbers = #tpu.dot_dimension_numbers<[1], [0], [0], [1], [0, 0, 1, 1], [], []>} : vector<8x128xf32>, vector<128x128xf32>, vector<8x128xf32> -> vector<8x128xf32>
      %cst_35 = arith.constant 0.000000e+00 : f32
      %71 = vector.broadcast %cst_35 : f32 to vector<8x1xf32>
      %72 = arith.subf %71, %36 : vector<8x1xf32>
      %73 = vector.broadcast %72 : vector<8x1xf32> to vector<8x128xf32>
      %74 = arith.maximumf %73, %70 : vector<8x128xf32>
      %75 = vector.broadcast %36 : vector<8x1xf32> to vector<8x128xf32>
      %76 = arith.minimumf %75, %74 : vector<8x128xf32>
      %77 = vector.broadcast %36 : vector<8x1xf32> to vector<8x128xf32>
      %78 = arith.addf %76, %77 : vector<8x128xf32>
      %79 = vector.broadcast %42 : vector<8x1xf32> to vector<8x128xf32>
      %80 = arith.mulf %78, %79 : vector<8x128xf32>
      %81 = math.roundeven %80 : vector<8x128xf32>
      %82 = vector.broadcast %40 : vector<8x1xf32> to vector<8x128xf32>
      %83 = arith.mulf %81, %82 : vector<8x128xf32>
      %84 = vector.broadcast %36 : vector<8x1xf32> to vector<8x128xf32>
      %85 = arith.subf %83, %84 : vector<8x128xf32>
      %86 = arith.truncf %85 : vector<8x128xf32> to vector<8x128xbf16>
      %c0_36 = arith.constant 0 : index
      %87 = arith.index_cast %67 : i32 to index
      %88 = vector.load %arg7[%c0_36, %87] : memref<8x256xbf16, #tpu.memory_space<vmem>>, vector<8x128xbf16>
      tpu.vector_store %arg7[%c0_36, %87], %86 {strides = array<i32>} : memref<8x256xbf16, #tpu.memory_space<vmem>>, vector<8x128xbf16>,
      %c2_i32_37 = arith.constant 2 : i32
    } else {
    }
    %c0 = arith.constant 0 : index
    %c0_1 = arith.constant 0 : index
    %3 = vector.load %arg7[%c0, %c0_1] : memref<8x256xbf16, #tpu.memory_space<vmem>>, vector<8x256xbf16>
    %c0_2 = arith.constant 0 : index
    %c0_3 = arith.constant 0 : index
    %4 = vector.load %arg4[%c0_2, %c0_3] : memref<256x256xbf16, #tpu.memory_space<vmem>>, vector<256x256xbf16>
    %cst = arith.constant dense<0.000000e+00> : vector<8x256xf32>
    %5 = tpu.matmul %3, %4, %cst {dimension_numbers = #tpu.dot_dimension_numbers<[1], [0], [0], [1], [0, 0, 1, 1], [], []>} : vector<8x256xbf16>, vector<256x256xbf16>, vector<8x256xf32> -> vector<8x256xf32>
    %c0_4 = arith.constant 0 : index
    %c0_5 = arith.constant 0 : index
    %6 = vector.load %arg5[%c0_4, %c0_5] : memref<1x256xf32, #tpu.memory_space<vmem>>, vector<1x256xf32>
    %7 = vector.broadcast %6 : vector<1x256xf32> to vector<8x256xf32>
    %8 = arith.addf %5, %7 : vector<8x256xf32>
    %c0_6 = arith.constant 0 : index
    %c0_7 = arith.constant 0 : index
    %9 = vector.load %arg6[%c0_6, %c0_7] : memref<8x256xf32, #tpu.memory_space<vmem>>, vector<8x256xf32>
    tpu.vector_store %arg6[%c0_6, %c0_7], %8 {strides = array<i32>} : memref<8x256xf32, #tpu.memory_space<vmem>>, vector<8x256xf32>,
    return
  }
  func.func @transform_0(%arg0: i32, %arg1: i32) -> (i32, i32) {
    %c0_i32 = arith.constant 0 : i32
    %c0_i32_0 = arith.constant 0 : i32
    return %arg0, %c0_i32 : i32, i32
  }
  func.func @transform_1(%arg0: i32, %arg1: i32) -> (i32, i32) {
    %c0_i32 = arith.constant 0 : i32
    %c0_i32_0 = arith.constant 0 : i32
    %c0_i32_1 = arith.constant 0 : i32
    return %c0_i32, %c0_i32_0 : i32, i32
  }
  func.func @transform_2(%arg0: i32, %arg1: i32) -> (i32, i32) {
    %c0_i32 = arith.constant 0 : i32
    %c0_i32_0 = arith.constant 0 : i32
    return %c0_i32, %arg1 : i32, i32
  }
  func.func @transform_3(%arg0: i32, %arg1: i32) -> (i32, i32) {
    %c0_i32 = arith.constant 0 : i32
    %c0_i32_0 = arith.constant 0 : i32
    return %c0_i32, %arg1 : i32, i32
  }
  func.func @transform_4(%arg0: i32, %arg1: i32) -> (i32, i32) {
    %c0_i32 = arith.constant 0 : i32
    return %arg0, %arg1 : i32, i32
  }
}

</mosaic_0001>

<bundles_post_ra>
// kernel: tpu_custom_call.1
= control target key start
LH: loop header
LB: loop body
LE: loop exit
PB: predicated region body
PF: predicated region fallthrough
CT: control target
= control target key end

     0   :  { %9 = vsyncpa [#allocation4], 0  ;;  %s1153_s0 = inlined_call_operand.hbm [shape: f32[8,256], index: 0, kind: input, shape index: {}]   ;;  %s1154_s1 = inlined_call_operand.hbm [shape: f32[128,128], index: 1, kind: input, shape index: {}]   ;;  %s1155_s2 = inlined_call_operand.hbm [shape: bf16[256,256], index: 2, kind: input, shape index: {}]   ;;  %s1156_s3 = inlined_call_operand.vmem [shape: f32[1,256], index: 3, kind: input, shape index: {}]   ;;  %s1157_s4 = inlined_call_operand.hbm [shape: f32[8,256], index: 4, kind: output, shape index: {}]  }
   0x1   :  { %10 = vsyncpa [#allocation7], 0 }
   0x2   :  { %11 = vsyncpa [#allocation5], 0  ;;  %s1027_s15 = smov [#allocation6]   ;;  %s933_s19 = scalar_lea.hbm %s1154_s1, 2048 }
   0x3   :  { %s27_s16 = sshll.u32 %s1027_s15, 4  ;;  %p934_p0 = scmp.ne.s32.totalorder %s1154_s1, %s933_s19  ;;  %s28_s16 = int_to_ptr.vmem [resolvable:$true] %s27_s16 }
   0x4   :  { %p937_p1 = scmp.lt.u32.totalorder %s933_s19, %s1154_s1 }
   0x6   :  { %p939_p2 = pnand %p937_p1, %p934_p0 }
   0x8   :  { %942 = shalt.err (!%p939_p2)
}
   0x9   :  { %s943_s24 = scalar_lea.vmem %s28_s16, 2048  ;;  %p948_p4 = scmp.lt.s32.totalorder %s28_s16, %s28_s16 }
   0xa   :  { %p944_p3 = scmp.ne.s32.totalorder %s28_s16, %s943_s24  ;;  %p949_p5 = scmp.lt.s32.totalorder %s943_s24, %s943_s24 }
   0xc   :  { %p950_p6 = por %p949_p5, %p948_p4 }
   0xe   :  { %p951_p7 = pnand %p950_p6, %p944_p3 }
  0x10   :  { %954 = shalt.err (!%p951_p7)
}
  0x11   :  { %s1028_s25 = smov 128   ;;  %s1029_s26 = smov 8  }
  0x12   :  { %33 = dma.hbm_to_vmem [thread:$0]  %s1154_s1, 2048, %s28_s16, [#allocation7], %s1028_s25, %s1028_s25, %s1029_s26  }
  0x13   :  { %s1030_s29 = smov [#allocation3]   ;;  %s1031_s5 = smov [#allocation8]  }
  0x14   :  { %s18_s30 = sshll.u32 %s1030_s29, 4  ;;  %s39_s6 = sshll.u32 %s1031_s5, 4  ;;  %s19_s30 = int_to_ptr.vmem [resolvable:$true] %s18_s30  ;;  %s40_s6 = int_to_ptr.vmem [resolvable:$true] %s39_s6 }
  0x15   :  { %s955_s9 = scalar_lea.hbm %s1153_s0, 256 }
  0x16   :  { %p956_p8 = scmp.ne.s32.totalorder %s1153_s0, %s955_s9  ;;  %p959_p9 = scmp.lt.u32.totalorder %s955_s9, %s1153_s0 }
  0x18   :  { %p961_p10 = pnand %p959_p9, %p956_p8 }
  0x1a   :  { %964 = shalt.err (!%p961_p10)
}
  0x1b   :  { %s965_s1 = scalar_lea.vmem %s19_s30, 256  ;;  %p970_p12 = scmp.lt.s32.totalorder %s19_s30, %s19_s30 }
  0x1c   :  { %p966_p11 = scmp.ne.s32.totalorder %s19_s30, %s965_s1  ;;  %p971_p13 = scmp.lt.s32.totalorder %s965_s1, %s965_s1 }
  0x1e   :  { %p972_p0 = por %p971_p13, %p970_p12 }
  0x20   :  { %p973_p1 = pnand %p972_p0, %p966_p11 }
  0x22   :  { %976 = shalt.err (!%p973_p1)
}
  0x23   :  { %21 = dma.hbm_to_vmem [thread:$0]  %s1153_s0, 256, %s19_s30, [#allocation4]  }
  0x24   :  { %s977_s18 = scalar_lea.hbm %s1155_s2, 4096 }
  0x25   :  { %p978_p2 = scmp.ne.s32.totalorder %s1155_s2, %s977_s18  ;;  %p981_p3 = scmp.lt.u32.totalorder %s977_s18, %s1155_s2 }
  0x27   :  { %p983_p4 = pnand %p981_p3, %p978_p2 }
  0x29   :  { %986 = shalt.err (!%p983_p4)
}
  0x2a   :  { %s987_s23 = scalar_lea.vmem %s40_s6, 4096  ;;  %p992_p6 = scmp.lt.s32.totalorder %s40_s6, %s40_s6 }
  0x2b   :  { %p988_p5 = scmp.ne.s32.totalorder %s40_s6, %s987_s23  ;;  %p993_p7 = scmp.lt.s32.totalorder %s987_s23, %s987_s23 }
  0x2d   :  { %p994_p8 = por %p993_p7, %p992_p6 }
  0x2f   :  { %p995_p9 = pnand %p994_p8, %p988_p5 }
  0x31   :  { %998 = shalt.err (!%p995_p9)
}
  0x32   :  { %45 = dma.hbm_to_vmem [thread:$0]  %s1155_s2, 4096, %s40_s6, [#allocation7], %s1028_s25, %s1028_s25, %s1029_s26  }
  0x33   :  { %1021 = dma.done.wait [#allocation4], 256  }
  0x34   :  { %1022 = vsyncadd [#allocation4], 4294967040 }
  0x35   :  { %1023 = dma.done.wait [#allocation7], 6144  }
  0x36   :  { %1024 = vsyncadd [#allocation7], 4294961152  ;;  %v1032_v0 = vmov 0.0|0.0   ;;  %vm1033_vm0 = vmmov 0   ;;  %v1034_v1 = vmov 0.0   ;;  %v61_v2 = vld [vmem:[#allocation6] sm:$0xff] }
  0x37   :  { %796 = vmatprep.subr.bf16.mxu0 %v1032_v0  ;;  %723 = vmatprep.mubr.msk.f32.mxu0 %vm1033_vm0, %v1034_v1  ;;  %v62_v3 = vld [vmem:[#allocation6 + $0x8] sm:$0xff]  ;;  %v63_v4 = vld [vmem:[#allocation6 + $0x10] sm:$0xff]  ;;  %v64_v6 = vld [vmem:[#allocation6 + $0x18] sm:$0xff]  ;;  %s1035_s26 = smov [#allocation9]  }
  0x38   :  { %v797_v5 = vpack.c.bf16 %v62_v3, %v61_v2  ;;  %v800_v7 = vpack.c.bf16 %v64_v6, %v63_v4  ;;  %v65_v8 = vld [vmem:[#allocation6 + $0x20] sm:$0xff]  ;;  %v66_v9 = vld [vmem:[#allocation6 + $0x28] sm:$0xff]  ;;  %v67_v10 = vld [vmem:[#allocation6 + $0x30] sm:$0xff]  ;;  %s596_s27 = sshll.u32 %s1035_s26, 4  ;;  %s597_s27 = int_to_ptr.vmem [resolvable:$true] %s596_s27 }
  0x39   :  { %v68_v11 = vld [vmem:[#allocation6 + $0x38] sm:$0xff]  ;;  %v803_v12 = vpack.c.bf16 %v66_v9, %v65_v8  ;;  %v69_v13 = vld [vmem:[#allocation6 + $0x40] sm:$0xff]  ;;  %v70_v14 = vld [vmem:[#allocation6 + $0x48] sm:$0xff]  ;;  %s999_s28 = scalar_lea.vmem %s597_s27, 256  ;;  %p1004_p11 = scmp.lt.s32.totalorder %s597_s27, %s597_s27 }
  0x3a   :  { %798 = vmatpush3.bf16.msra.mxu0 %v797_v5  ;;  %v806_v15 = vpack.c.bf16 %v68_v11, %v67_v10  ;;  %v71_v16 = vld [vmem:[#allocation6 + $0x50] sm:$0xff]  ;;  %v809_v17 = vpack.c.bf16 %v70_v14, %v69_v13  ;;  %v72_v18 = vld [vmem:[#allocation6 + $0x58] sm:$0xff]  ;;  %v73_v20 = vld [vmem:[#allocation6 + $0x60] sm:$0xff]  ;;  %p1000_p10 = scmp.ne.s32.totalorder %s597_s27, %s999_s28  ;;  %p1005_p12 = scmp.lt.s32.totalorder %s999_s28, %s999_s28 }
  0x3b   :  { %799 = vmatprep.subr.bf16.mxu0 %v1032_v0  ;;  %v812_v19 = vpack.c.bf16 %v72_v18, %v71_v16  ;;  %v74_v21 = vld [vmem:[#allocation6 + $0x68] sm:$0xff]  ;;  %v75_v23 = vld [vmem:[#allocation6 + $0x70] sm:$0xff]  ;;  %v76_v24 = vld [vmem:[#allocation6 + $0x78] sm:$0xff] }
  0x3c   :  { %v815_v22 = vpack.c.bf16 %v74_v21, %v73_v20  ;;  %v818_v25 = vpack.c.bf16 %v76_v24, %v75_v23  ;;  %v77_v26 = vld [vmem:[#allocation3] sm:$0xff]  ;;  %v153_v27 = vld [vmem:[#allocation3 + $0x8] sm:$0xff]  ;;  %v879_v31 = vld [vmem:[#allocation8 + $0x4] ss:$8 sps:$4 sm:$0xff]   ;;  %p1006_p13 = por %p1005_p12, %p1004_p11 }
  0x3d   :  { %v881_v32 = vld [vmem:[#allocation8] ss:$8 sps:$4 sm:$0xff]   ;;  %v882_v33 = vld [vmem:[#allocation8 + $0x14] ss:$8 sps:$4 sm:$0xff]   ;;  %547 = vmatprep.subr.bf16.mxu1 %v879_v31  ;;  %v884_v37 = vld [vmem:[#allocation8 + $0x10] ss:$8 sps:$4 sm:$0xff]  }
  0x3e   :  { %801 = vmatpush3.bf16.msra.mxu0 %v800_v7  ;;  %548 = vmatpush1.bf16.msra.mxu1 %v881_v32  ;;  %v885_v38 = vld [vmem:[#allocation8 + $0x24] ss:$8 sps:$4 sm:$0xff]   ;;  %v887_v39 = vld [vmem:[#allocation8 + $0x20] ss:$8 sps:$4 sm:$0xff]   ;;  %v888_v40 = vld [vmem:[#allocation8 + $0x34] ss:$8 sps:$4 sm:$0xff]   ;;  %p1007_p0 = pnand %p1006_p13, %p1000_p10 }
  0x3f   :  { %802 = vmatprep.subr.bf16.mxu0 %v1032_v0  ;;  %549 = vmatprep.subr.bf16.mxu1 %v882_v33  ;;  %v890_v41 = vld [vmem:[#allocation8 + $0x30] ss:$8 sps:$4 sm:$0xff]   ;;  %v891_v42 = vld [vmem:[#allocation8 + $0x44] ss:$8 sps:$4 sm:$0xff]   ;;  %v893_v43 = vld [vmem:[#allocation8 + $0x40] ss:$8 sps:$4 sm:$0xff]  }
  0x40   :  { %v894_v44 = vld [vmem:[#allocation8 + $0x54] ss:$8 sps:$4 sm:$0xff]   ;;  %v896_v45 = vld [vmem:[#allocation8 + $0x50] ss:$8 sps:$4 sm:$0xff]   ;;  %v897_v46 = vld [vmem:[#allocation8 + $0x64] ss:$8 sps:$4 sm:$0xff]  }
  0x41   :  { %v899_v47 = vld [vmem:[#allocation8 + $0x60] ss:$8 sps:$4 sm:$0xff]   ;;  %v900_v48 = vld [vmem:[#allocation8 + $0x74] ss:$8 sps:$4 sm:$0xff]   ;;  %v902_v49 = vld [vmem:[#allocation8 + $0x70] ss:$8 sps:$4 sm:$0xff]  }
  0x42   :  { %804 = vmatpush3.bf16.msra.mxu0 %v803_v12  ;;  %550 = vmatpush1.bf16.msra.mxu1 %v884_v37  ;;  %v903_v51 = vld [vmem:[#allocation8 + $0x84] ss:$8 sps:$4 sm:$0xff]   ;;  %v905_v53 = vld [vmem:[#allocation8 + $0x80] ss:$8 sps:$4 sm:$0xff]   ;;  %v906_v54 = vld [vmem:[#allocation8 + $0x94] ss:$8 sps:$4 sm:$0xff]  }
  0x43   :  { %805 = vmatprep.subr.bf16.mxu0 %v1032_v0  ;;  %551 = vmatprep.subr.bf16.mxu1 %v885_v38  ;;  %v908_v55 = vld [vmem:[#allocation8 + $0x90] ss:$8 sps:$4 sm:$0xff]   ;;  %v909_v56 = vld [vmem:[#allocation8 + $0xa4] ss:$8 sps:$4 sm:$0xff]   ;;  %v911_v57 = vld [vmem:[#allocation8 + $0xa0] ss:$8 sps:$4 sm:$0xff]   ;;  %v370_v38 = vlaneseq }
  0x44   :  { %v912_v58 = vld [vmem:[#allocation8 + $0xb4] ss:$8 sps:$4 sm:$0xff]   ;;  %v914_v59 = vld [vmem:[#allocation8 + $0xb0] ss:$8 sps:$4 sm:$0xff]   ;;  %v915_v60 = vld [vmem:[#allocation8 + $0xc4] ss:$8 sps:$4 sm:$0xff]  }
  0x45   :  { %v917_v61 = vld [vmem:[#allocation8 + $0xc0] ss:$8 sps:$4 sm:$0xff]   ;;  %v918_v62 = vld [vmem:[#allocation8 + $0xd4] ss:$8 sps:$4 sm:$0xff]   ;;  %v920_v63 = vld [vmem:[#allocation8 + $0xd0] ss:$8 sps:$4 sm:$0xff]  }
  0x46   :  { %807 = vmatpush3.bf16.msra.mxu0 %v806_v15  ;;  %552 = vmatpush1.bf16.msra.mxu1 %v887_v39  ;;  %v924_v2 = vld [vmem:[#allocation8 + $0xf4] ss:$8 sps:$4 sm:$0xff]   ;;  %v926_v3 = vld [vmem:[#allocation8 + $0xf0] ss:$8 sps:$4 sm:$0xff]   ;;  %v371_v39 = vshrl.u32 %v370_v38, 7 }
  0x47   :  { %808 = vmatprep.subr.bf16.mxu0 %v1032_v0  ;;  %553 = vmatprep.subr.bf16.mxu1 %v888_v40 }
  0x48   :  { %v372_v40 = vsub.s32 0, %v371_v39 }
  0x4a   :  { %810 = vmatpush3.bf16.msra.mxu0 %v809_v17  ;;  %554 = vmatpush1.bf16.msra.mxu1 %v890_v41  ;;  %v368_v41 = vld [vmem:[%s1156_s3] sm:$0x3] }
  0x4b   :  { %811 = vmatprep.subr.bf16.mxu0 %v1032_v0  ;;  %555 = vmatprep.subr.bf16.mxu1 %v891_v42  ;;  %v376_v42 = vsub.s32 1, %v371_v39 }
  0x4e   :  { %813 = vmatpush3.bf16.msra.mxu0 %v812_v19  ;;  %556 = vmatpush1.bf16.msra.mxu1 %v893_v43  ;;  %v373_v43 = vrot.slane %v368_v41, %v372_v40 }
  0x4f   :  { %814 = vmatprep.subr.bf16.mxu0 %v1032_v0  ;;  %557 = vmatprep.subr.bf16.mxu1 %v894_v44  ;;  %v377_v44 = vrot.slane %v368_v41, %v376_v42 }
  0x52   :  { %816 = vmatpush3.bf16.msra.mxu0 %v815_v22  ;;  %558 = vmatpush1.bf16.msra.mxu1 %v896_v45 }
  0x53   :  { %817 = vmatprep.subr.bf16.mxu0 %v1032_v0  ;;  %559 = vmatprep.subr.bf16.mxu1 %v897_v46 }
  0x56   :  { %819 = vmatpush3.bf16.msra.mxu0 %v818_v25  ;;  %560 = vmatpush1.bf16.msra.mxu1 %v899_v47 }
  0x57   :  { %820 = vmatprep.subr.bf16.mxu0 %v1032_v0  ;;  %561 = vmatprep.subr.bf16.mxu1 %v900_v48 }
  0x59   :  { %724 = vmatmul.mubr.f32.vlgmr.msra.gmra.mrb[0].mxu0 %v77_v26 }
  0x5a   :  { %822 = vmatpush3.bf16.msra.mxu0 %v797_v5  ;;  %758 = vmatprep.mubr.msk.f32.mxu0 %vm1033_vm0, %v1034_v1 }
  0x5b   :  { %823 = vmatprep.subr.bf16.mxu0 %v1032_v0  ;;  %562 = vmatpush1.bf16.msra.mxu1 %v902_v49 }
  0x5c   :  { %563 = vmatprep.subr.bf16.mxu1 %v903_v51 }
  0x5e   :  { %825 = vmatpush3.bf16.msra.mxu0 %v800_v7 }
  0x5f   :  { %826 = vmatprep.subr.bf16.mxu0 %v1032_v0  ;;  %564 = vmatpush1.bf16.msra.mxu1 %v905_v53 }
  0x60   :  { %565 = vmatprep.subr.bf16.mxu1 %v906_v54 }
  0x62   :  { %828 = vmatpush3.bf16.msra.mxu0 %v803_v12 }
  0x63   :  { %829 = vmatprep.subr.bf16.mxu0 %v1032_v0  ;;  %566 = vmatpush1.bf16.msra.mxu1 %v908_v55 }
  0x64   :  { %567 = vmatprep.subr.bf16.mxu1 %v909_v56 }
  0x66   :  { %831 = vmatpush3.bf16.msra.mxu0 %v806_v15 }
  0x67   :  { %832 = vmatprep.subr.bf16.mxu0 %v1032_v0  ;;  %568 = vmatpush1.bf16.msra.mxu1 %v911_v57 }
  0x68   :  { %569 = vmatprep.subr.bf16.mxu1 %v912_v58 }
  0x6a   :  { %834 = vmatpush3.bf16.msra.mxu0 %v809_v17 }
  0x6b   :  { %835 = vmatprep.subr.bf16.mxu0 %v1032_v0  ;;  %570 = vmatpush1.bf16.msra.mxu1 %v914_v59 }
  0x6c   :  { %571 = vmatprep.subr.bf16.mxu1 %v915_v60 }
  0x6e   :  { %837 = vmatpush3.bf16.msra.mxu0 %v812_v19 }
  0x6f   :  { %838 = vmatprep.subr.bf16.mxu0 %v1032_v0  ;;  %572 = vmatpush1.bf16.msra.mxu1 %v917_v61 }
  0x70   :  { %573 = vmatprep.subr.bf16.mxu1 %v918_v62 }
  0x72   :  { %840 = vmatpush3.bf16.msra.mxu0 %v815_v22 }
  0x73   :  { %841 = vmatprep.subr.bf16.mxu0 %v1032_v0  ;;  %574 = vmatpush1.bf16.msra.mxu1 %v920_v63 }
  0x76   :  { %843 = vmatpush3.bf16.msra.mxu0 %v818_v25 }
  0x77   :  { %844 = vmatprep.subr.bf16.mxu0 %v1032_v0 }
  0x79   :  { %759 = vmatmul.mubr.f32.vlgmr.msra.gmra.mrb[2].mxu0 %v153_v27 }
  0x7a   :  { %846 = vmatpush3.bf16.msra.mxu0 %v797_v5  ;;  %793 = vmatprep.mubr.msk.f32.mxu0 %vm1033_vm0, %v1034_v1  ;;  %v923_v1 = vld [vmem:[#allocation8 + $0xe0] ss:$8 sps:$4 sm:$0xff]  }
  0x7b   :  { %847 = vmatprep.subr.bf16.mxu0 %v1032_v0 }
  0x7e   :  { %849 = vmatpush3.bf16.msra.mxu0 %v800_v7 }
  0x7f   :  { %850 = vmatprep.subr.bf16.mxu0 %v1032_v0 }
  0x82   :  { %852 = vmatpush3.bf16.msra.mxu0 %v803_v12 }
  0x83   :  { %853 = vmatprep.subr.bf16.mxu0 %v1032_v0 }
  0x86   :  { %855 = vmatpush3.bf16.msra.mxu0 %v806_v15 }
  0x87   :  { %856 = vmatprep.subr.bf16.mxu0 %v1032_v0 }
  0x8a   :  { %858 = vmatpush3.bf16.msra.mxu0 %v809_v17 }
  0x8b   :  { %859 = vmatprep.subr.bf16.mxu0 %v1032_v0 }
  0x8e   :  { %861 = vmatpush3.bf16.msra.mxu0 %v812_v19 }
  0x8f   :  { %862 = vmatprep.subr.bf16.mxu0 %v1032_v0 }
  0x92   :  { %864 = vmatpush3.bf16.msra.mxu0 %v815_v22 }
  0x93   :  { %865 = vmatprep.subr.bf16.mxu0 %v1032_v0  ;;  %v921_v0 = vld [vmem:[#allocation8 + $0xe4] ss:$8 sps:$4 sm:$0xff]  }
  0x94   :  { %575 = vmatprep.subr.bf16.mxu1 %v921_v0 }
  0x95   :  { %576 = vmatpush1.bf16.msra.mxu1 %v923_v1 }
  0x96   :  { %867 = vmatpush3.bf16.msra.mxu0 %v818_v25  ;;  %577 = vmatprep.subr.bf16.mxu1 %v924_v2 }
  0x99   :  { %794 = vmatmul.mubr.f32.vlgmr.msra.gmra.mrb[4].mxu0 %v153_v27  ;;  %578 = vmatpush1.bf16.msra.mxu1 %v926_v3 }
 0x12c   :  { %v1133_v28 = vpop.f32.mrb[0].mxu0 }
 0x12d   :  { %v725_v29 = vpop.f32.mrb[1].mxu0  ;;  %v148_v30 = vmul.f32 %v1133_v28, %v1133_v28 }
 0x12f   :  { %149 = vadd.xlane.f32.xlu0 %v148_v30 }
 0x14c   :  { %v220_v34 = vpop.f32.mrb[2].mxu0 }
 0x14d   :  { %v224_v35 = vmul.f32 %v220_v34, %v220_v34  ;;  %v760_v36 = vpop.f32.mrb[3].mxu0 }
 0x14f   :  { %225 = vadd.xlane.f32.xlu0 %v224_v35 }
 0x16c   :  { %v321_v50 = vpop.f32.mrb[4].mxu0 }
 0x16d   :  { %v795_v52 = vpop.f32.mrb[5].mxu0 }
 0x1bc   :  { %v150_v4 = vpop.xlane.xlu0 %149 }
 0x1dc   :  { %v226_v5 = vpop.xlane.xlu0 %225 }
 0x1dd   :  { %v227_v6 = vadd.f32 %v226_v5, %v150_v4 }
 0x1df   :  { %v229_v7 = vmul.f32 0.00390625, %v227_v6 }
 0x1e1   :  { %929 = vrsqrt.f32 %v229_v7  ;;  %vm232_vm1 = vcmp.eq.f32.partialorder %v229_v7, inf  ;;  %v235_v10 = vand.u32 2147483648, %v229_v7  ;;  %vm234_vm2 = vcmp.eq.f32.partialorder %v229_v7, 0.0 }
 0x1eb   :  { %v930_v8 = vpop.eup %929 }
 0x1ec   :  { %v231_v9 = vmul.f32 %v930_v8, %v229_v7 }
 0x1ee   :  { %v233_v11 = vsel %vm232_vm1, %v229_v7, %v231_v9 }
 0x1ef   :  { %v236_v12 = vsel %vm234_vm2, %v235_v10, %v233_v11 }
 0x1f0   :  { %v237_v13 = vadd.f32 1e-08, %v236_v12 }
 0x1f2   :  { %v238_v14 = vmul.f32 2.5139306, %v237_v13 }
 0x1f4   :  { %v239_v15 = vmul.f32 2.0, %v238_v14  ;;  %v244_v16 = vsub.f32 0.0, %v238_v14 }
 0x1f6   :  { %v241_v17 = vmul.f32 0.06666667, %v239_v15  ;;  %v245_v18 = vmax.f32 %v244_v16, %v1133_v28  ;;  %v325_v19 = vmax.f32 %v244_v16, %v321_v50 }
 0x1f8   :  { %931 = vrcp.f32 %v241_v17  ;;  %v246_v20 = vmin.f32 %v238_v14, %v245_v18  ;;  %v326_v21 = vmin.f32 %v238_v14, %v325_v19 }
 0x1fa   :  { %v247_v22 = vadd.f32 %v246_v20, %v238_v14  ;;  %v327_v23 = vadd.f32 %v326_v21, %v238_v14 }
 0x202   :  { %v932_v24 = vpop.eup %931 }
 0x203   :  { %v248_v25 = vmul.f32 %v932_v24, %v247_v22  ;;  %v328_v26 = vmul.f32 %v932_v24, %v327_v23 }
 0x205   :  { %v868_v27 = vround.rtne.f32 %v248_v25  ;;  %v869_v29 = vround.rtne.f32 %v328_v26 }
 0x207   :  { %v250_v30 = vmul.f32 %v868_v27, %v241_v17  ;;  %v330_v31 = vmul.f32 %v869_v29, %v241_v17 }
 0x209   :  { %v251_v32 = vsub.f32 %v250_v30, %v238_v14  ;;  %v331_v33 = vsub.f32 %v330_v31, %v238_v14 }
 0x20b   :  { %v252_v34 = vpack.c.bf16 %v251_v32, %v251_v32  ;;  %v332_v35 = vpack.c.bf16 %v331_v33, %v331_v33 }
 0x20d   :  { %253 = vst [vmem:[#allocation2] sm:$0xf] %v252_v34  ;;  %334 = vst [vmem:[#allocation2 + $0x4] sm:$0xf] %v332_v35 }
 0x214   :  { %v335_v36 = vld [vmem:[#allocation2] sm:$0xff] }
 0x215   :  { %v606_v28 = vcombine.low %v335_v36, %v335_v36  ;;  %v607_v37 = vcombine.high %v335_v36, %v335_v36 }
 0x217   :  { %579 = vmatprep.mubr.bf16.mxu1 %v607_v37 }
 0x218   :  { %580 = vmatmul.mubr.bf16.vlgmr.msra.gmra.mrb[0].mxu1 %v606_v28 }
 0x2eb   :  { %v581_v45 = vpop.f32.mrb[0].mxu1 }
 0x2ec   :  { %v582_v46 = vadd.f32 %v581_v45, %v373_v43  ;;  %v583_v47 = vpop.f32.mrb[1].mxu1 }
 0x2ed   :  { %v584_v48 = vadd.f32 %v583_v47, %v377_v44  ;;  %v585_v49 = vpop.f32.mrb[2].mxu1 }
 0x2ee   :  { %588 = vst [vmem:[#allocation9] sm:$0xff] %v582_v46  ;;  %v586_v50 = vpop.f32.mrb[3].mxu1 }
 0x2ef   :  { %589 = vst [vmem:[#allocation9 + $0x8] sm:$0xff] %v584_v48 }
 0x2f0   :  { %1010 = shalt.err (!%p1007_p0)
}
 0x2f1   :  { %s1011_s30 = scalar_lea.hbm %s1157_s4, 256 }
 0x2f2   :  { %p1012_p1 = scmp.ne.s32.totalorder %s1157_s4, %s1011_s30  ;;  %p1015_p2 = scmp.lt.u32.totalorder %s1011_s30, %s1157_s4 }
 0x2f4   :  { %p1017_p3 = pnand %p1015_p2, %p1012_p1 }
 0x2f6   :  { %1020 = shalt.err (!%p1017_p3)
}
 0x2f7   :  { %599 = dma.vmem_to_hbm [thread:$0]  %s597_s27, 256, %s1157_s4, [#allocation5]  }
 0x2f8   :  { %1025 = dma.done.wait [#allocation5], 256  }
 0x2f9   :  { %1026 = vsyncadd [#allocation5], 4294967040 }
 0x2fa   :  { %603 = vsyncpa [#allocation4], 1 }
 0x2fb   :  { %604 = vsyncpa [#allocation7], 1 }
 0x2fc   :  { %605 = vsyncpa [#allocation5], 1 }

</bundles_post_ra>
